<compile_context>
chip_gen: v6e
topology: v6e:2x2x1
jax: 0.10.0
libtpu: 0.0.40
codegen_flags: <defaults>
</compile_context>

<pallas_src>
import functools

import jax
import jax.numpy as jnp
from jax.experimental import pallas as pl
from jax.experimental.pallas import tpu as pltpu

_ALPHA = 0.25
_GAMMA = 2.0
_APPLY_SIGMOID = True

# Matches PyTorch F.binary_cross_entropy, which clamps log terms to >= -100.
_LOG_CLAMP = -100.0

_SUBLANES = 8
_LANES = 128
_WIDE_LANES = 1024             # lane-dense slab width for large inputs
_WIDE_THRESHOLD = 1 << 20      # use the wide slab only when padding waste is tiny
_MAX_BLOCK_ELEMS = 512 * 1024  # 2 MiB per f32 buffer per block


def _round_up(x, m):
    return ((x + m - 1) // m) * m


def _focal_loss_kernel(pred_ref, target_ref, out_ref, *, alpha, gamma,
                       apply_sigmoid):
    # Compute in f32 (v5e has no bf16 VPU/EUP; explicit upcast avoids repacking).
    x = pred_ref[...].astype(jnp.float32)
    t = target_ref[...].astype(jnp.float32)

    if apply_sigmoid:
        # BCE-with-logits formulation: one exp + one log + one reciprocal.
        #   log(sigmoid(x))     = min(x, 0)  - log(1 + exp(-|x|))
        #   log(1 - sigmoid(x)) = min(-x, 0) - log(1 + exp(-|x|))
        # This is numerically nicer than sigmoid followed by two logs and
        # agrees with the PyTorch reference to fp precision for ordinary
        # logits; the -100 clamp below still bounds extreme logits.
        e = jnp.exp(-jnp.abs(x))          # exp(-|x|) in (0, 1] -- never overflows
        lg = jnp.log(1.0 + e)             # 1+e in (1, 2] so the log is safe
        log_p = jnp.minimum(x, 0.0) - lg
        log_1mp = jnp.minimum(-x, 0.0) - lg
        inv = 1.0 / (1.0 + e)
        p = jnp.where(x >= 0.0, inv, e * inv)   # sigmoid(x), reusing the same exp
    else:
        p = x
        log_p = jnp.log(p)
        log_1mp = jnp.log(1.0 - p)

    # binary_cross_entropy(reduction='none') with PyTorch's log clamping.
    log_p = jnp.maximum(log_p, _LOG_CLAMP)
    log_1mp = jnp.maximum(log_1mp, _LOG_CLAMP)
    ce = -(t * log_p + (1.0 - t) * log_1mp)

    alpha_w = t * alpha + (1.0 - t) * (1.0 - alpha)
    # pt = where(t == 1, p, 1 - p)  =>  1 - pt = where(t == 1, 1 - p, p)
    one_minus_pt = jnp.where(t == 1.0, 1.0 - p, p)

    if gamma == 2.0:
        focal = one_minus_pt * one_minus_pt       # VPU multiply, no pow/EUP
    elif gamma == 1.0:
        focal = one_minus_pt
    elif gamma == 0.0:
        focal = jnp.ones_like(one_minus_pt)
    else:
        focal = one_minus_pt ** gamma

    out_ref[...] = (alpha_w * focal * ce).astype(out_ref.dtype)


def focal_loss(pred, target, alpha=_ALPHA, gamma=_GAMMA,
               apply_sigmoid=_APPLY_SIGMOID):
    """Elementwise focal loss; returns array with the same shape as `pred`."""
    assert pred.shape == target.shape
    orig_shape = pred.shape
    out_dtype = pred.dtype
    n = pred.size

    # --- choose a lane-dense slab layout and block size -----------------------
    cols = _WIDE_LANES if n >= _WIDE_THRESHOLD else _LANES
    min_tile = _SUBLANES * cols                        # minimal (8, cols) tile
    n_pad = _round_up(n, min_tile)
    rows = n_pad // cols                               # multiple of 8
    block_rows = min(_MAX_BLOCK_ELEMS // cols, rows)   # multiple of 8
    grid = (pl.cdiv(rows, block_rows),)                # partial last block is OK

    # --- flatten (and pad only if the size is not already tile-aligned) ------
    pred_flat = pred.reshape(-1)
    target_flat = target.reshape(-1)
    pad = n_pad - n
    if pad:
        pred_flat = jnp.pad(pred_flat, (0, pad))
        target_flat = jnp.pad(target_flat, (0, pad))
    pred_2d = pred_flat.reshape(rows, cols)
    target_2d = target_flat.reshape(rows, cols)

    kernel = functools.partial(
        _focal_loss_kernel,
        alpha=float(alpha),
        gamma=float(gamma),
        apply_sigmoid=bool(apply_sigmoid),
    )

    block = (block_rows, cols)
    out_2d = pl.pallas_call(
        kernel,
        out_shape=jax.ShapeDtypeStruct((rows, cols), out_dtype),
        grid_spec=pltpu.PrefetchScalarGridSpec(
            num_scalar_prefetch=0,
            grid=grid,
            in_specs=[
                pl.BlockSpec(block, lambda i: (i, 0)),
                pl.BlockSpec(block, lambda i: (i, 0)),
            ],
            out_specs=pl.BlockSpec(block, lambda i: (i, 0)),
        ),
        compiler_params=pltpu.CompilerParams(
            dimension_semantics=("parallel",)),
    )(pred_2d, target_2d)

    out_flat = out_2d.reshape(-1)
    if pad:
        out_flat = out_flat[:n]
    return out_flat.reshape(orig_shape)


def _focal_loss_ref(pred, target, alpha=_ALPHA, gamma=_GAMMA,
                    apply_sigmoid=_APPLY_SIGMOID):
    """Pure-JAX reference mirroring the PyTorch module exactly."""
    if apply_sigmoid:
        pred = jax.nn.sigmoid(pred)
    log_p = jnp.maximum(jnp.log(pred), _LOG_CLAMP)
    log_1mp = jnp.maximum(jnp.log(1.0 - pred), _LOG_CLAMP)
    ce = -(target * log_p + (1.0 - target) * log_1mp)
    alpha_w = target * alpha + (1.0 - target) * (1.0 - alpha)
    pt = jnp.where(target == 1.0, pred, 1.0 - pred)
    return alpha_w * (1.0 - pt) ** gamma * ce


if __name__ == "__main__":
    key = jax.random.PRNGKey(0)

    # NCHW: batch=2, channels=4, spatial=16x16 (e.g. FCOS classification logits)
    k1, k2, k3, k4 = jax.random.split(key, 4)
    shape = (2, 4, 16, 16)
    pred = jax.random.normal(k1, shape, dtype=jnp.float32)
    target = (jax.random.uniform(k2, shape) > 0.8).astype(jnp.float32)

    out = focal_loss(pred, target)
    out = jax.block_until_ready(out)
    ref = _focal_loss_ref(pred, target)
    assert out.shape == shape
    assert jnp.allclose(out, ref, atol=1e-5, rtol=1e-5), "mismatch vs reference"

    # Also exercise the non-tile-aligned (padding) path with an odd shape.
    shape2 = (2, 3, 7, 5)
    pred2 = jax.random.normal(k3, shape2, dtype=jnp.float32)
    target2 = (jax.random.uniform(k4, shape2) > 0.8).astype(jnp.float32)
    out2 = jax.block_until_ready(focal_loss(pred2, target2))
    ref2 = _focal_loss_ref(pred2, target2)
    assert out2.shape == shape2
    assert jnp.allclose(out2, ref2, atol=1e-5, rtol=1e-5), "mismatch (padded)"

    print("KERNEL_OK")
</pallas_src>

<mosaic_0001>
module attributes {stable_mosaic.version = 11 : i64} {
  func.func @_focal_loss_kernel(%arg0: i32, %arg1: memref<16x128xf32, #tpu.memory_space<vmem>>, %arg2: memref<16x128xf32, #tpu.memory_space<vmem>>, %arg3: memref<16x128xf32, #tpu.memory_space<vmem>>) attributes {dimension_semantics = [#tpu.dimension_semantics<parallel>], iteration_bounds = array<i64: 1>, scalar_prefetch = 0 : i64, scratch_operands = 0 : i64, tpu.core_type = #tpu.core_type<tc>, window_params = [{transform_indices = @transform_0, window_bounds = array<i64: 16, 128>}, {transform_indices = @transform_1, window_bounds = array<i64: 16, 128>}, {transform_indices = @transform_2, window_bounds = array<i64: 16, 128>}]} {
    %c0 = arith.constant 0 : index
    %c0_0 = arith.constant 0 : index
    %0 = vector.load %arg1[%c0, %c0_0] : memref<16x128xf32, #tpu.memory_space<vmem>>, vector<16x128xf32>
    %c0_1 = arith.constant 0 : index
    %c0_2 = arith.constant 0 : index
    %1 = vector.load %arg2[%c0_1, %c0_2] : memref<16x128xf32, #tpu.memory_space<vmem>>, vector<16x128xf32>
    %2 = math.absf %0 : vector<16x128xf32>
    %cst = arith.constant 0.000000e+00 : f32
    %3 = vector.broadcast %cst : f32 to vector<16x128xf32>
    %4 = arith.subf %3, %2 : vector<16x128xf32>
    %5 = math.exp %4 : vector<16x128xf32>
    %cst_3 = arith.constant 1.000000e+00 : f32
    %6 = vector.broadcast %cst_3 : f32 to vector<16x128xf32>
    %7 = arith.addf %6, %5 : vector<16x128xf32>
    %8 = math.log %7 : vector<16x128xf32>
    %cst_4 = arith.constant 0.000000e+00 : f32
    %9 = vector.broadcast %cst_4 : f32 to vector<16x128xf32>
    %10 = arith.minimumf %0, %9 : vector<16x128xf32>
    %11 = arith.subf %10, %8 : vector<16x128xf32>
    %cst_5 = arith.constant 0.000000e+00 : f32
    %12 = vector.broadcast %cst_5 : f32 to vector<16x128xf32>
    %13 = arith.subf %12, %0 : vector<16x128xf32>
    %cst_6 = arith.constant 0.000000e+00 : f32
    %14 = vector.broadcast %cst_6 : f32 to vector<16x128xf32>
    %15 = arith.minimumf %13, %14 : vector<16x128xf32>
    %16 = arith.subf %15, %8 : vector<16x128xf32>
    %cst_7 = arith.constant 1.000000e+00 : f32
    %17 = vector.broadcast %cst_7 : f32 to vector<16x128xf32>
    %18 = arith.addf %17, %5 : vector<16x128xf32>
    %cst_8 = arith.constant 1.000000e+00 : f32
    %19 = vector.broadcast %cst_8 : f32 to vector<16x128xf32>
    %20 = arith.divf %19, %18 : vector<16x128xf32>
    %cst_9 = arith.constant 0.000000e+00 : f32
    %21 = vector.broadcast %cst_9 : f32 to vector<16x128xf32>
    %22 = arith.cmpf oge, %0, %21 : vector<16x128xf32>
    %23 = arith.mulf %5, %20 : vector<16x128xf32>
    %24 = arith.select %22, %20, %23 : vector<16x128xi1>, vector<16x128xf32>
    %cst_10 = arith.constant -1.000000e+02 : f32
    %25 = vector.broadcast %cst_10 : f32 to vector<16x128xf32>
    %26 = arith.maximumf %11, %25 : vector<16x128xf32>
    %cst_11 = arith.constant -1.000000e+02 : f32
    %27 = vector.broadcast %cst_11 : f32 to vector<16x128xf32>
    %28 = arith.maximumf %16, %27 : vector<16x128xf32>
    %29 = arith.mulf %1, %26 : vector<16x128xf32>
    %cst_12 = arith.constant 1.000000e+00 : f32
    %30 = vector.broadcast %cst_12 : f32 to vector<16x128xf32>
    %31 = arith.subf %30, %1 : vector<16x128xf32>
    %32 = arith.mulf %31, %28 : vector<16x128xf32>
    %33 = arith.addf %29, %32 : vector<16x128xf32>
    %cst_13 = arith.constant 0.000000e+00 : f32
    %34 = vector.broadcast %cst_13 : f32 to vector<16x128xf32>
    %35 = arith.subf %34, %33 : vector<16x128xf32>
    %cst_14 = arith.constant 2.500000e-01 : f32
    %36 = vector.broadcast %cst_14 : f32 to vector<16x128xf32>
    %37 = arith.mulf %1, %36 : vector<16x128xf32>
    %cst_15 = arith.constant 1.000000e+00 : f32
    %38 = vector.broadcast %cst_15 : f32 to vector<16x128xf32>
    %39 = arith.subf %38, %1 : vector<16x128xf32>
    %cst_16 = arith.constant 7.500000e-01 : f32
    %40 = vector.broadcast %cst_16 : f32 to vector<16x128xf32>
    %41 = arith.mulf %39, %40 : vector<16x128xf32>
    %42 = arith.addf %37, %41 : vector<16x128xf32>
    %cst_17 = arith.constant 1.000000e+00 : f32
    %43 = vector.broadcast %cst_17 : f32 to vector<16x128xf32>
    %44 = arith.cmpf oeq, %1, %43 : vector<16x128xf32>
    %cst_18 = arith.constant 1.000000e+00 : f32
    %45 = vector.broadcast %cst_18 : f32 to vector<16x128xf32>
    %46 = arith.subf %45, %24 : vector<16x128xf32>
    %47 = arith.select %44, %46, %24 : vector<16x128xi1>, vector<16x128xf32>
    %48 = arith.mulf %47, %47 : vector<16x128xf32>
    %49 = arith.mulf %42, %48 : vector<16x128xf32>
    %50 = arith.mulf %49, %35 : vector<16x128xf32>
    %c0_19 = arith.constant 0 : index
    %c0_20 = arith.constant 0 : index
    %51 = vector.load %arg3[%c0_19, %c0_20] : memref<16x128xf32, #tpu.memory_space<vmem>>, vector<16x128xf32>
    tpu.vector_store %arg3[%c0_19, %c0_20], %50 {strides = array<i32>} : memref<16x128xf32, #tpu.memory_space<vmem>>, vector<16x128xf32>,
    return
  }
  func.func @transform_0(%arg0: i32) -> (i32, i32) {
    %c0_i32 = arith.constant 0 : i32
    %c0_i32_0 = arith.constant 0 : i32
    return %arg0, %c0_i32 : i32, i32
  }
  func.func @transform_1(%arg0: i32) -> (i32, i32) {
    %c0_i32 = arith.constant 0 : i32
    %c0_i32_0 = arith.constant 0 : i32
    return %arg0, %c0_i32 : i32, i32
  }
  func.func @transform_2(%arg0: i32) -> (i32, i32) {
    %c0_i32 = arith.constant 0 : i32
    %c0_i32_0 = arith.constant 0 : i32
    return %arg0, %c0_i32 : i32, i32
  }
}

</mosaic_0001>

<bundles_post_ra>
// kernel: tpu_custom_call.1
= control target key start
LH: loop header
LB: loop body
LE: loop exit
PB: predicated region body
PF: predicated region fallthrough
CT: control target
= control target key end

     0   :  { %7 = vsyncpa [#allocation3], 0  ;;  %s252_s0 = inlined_call_operand.hbm [shape: f32[16,128], index: 0, kind: input, shape index: {}]   ;;  %s253_s1 = inlined_call_operand.hbm [shape: f32[16,128], index: 1, kind: input, shape index: {}]   ;;  %s254_s2 = inlined_call_operand.hbm [shape: f32[16,128], index: 2, kind: output, shape index: {}]  }
   0x1   :  { %8 = vsyncpa [#allocation6], 0 }
   0x2   :  { %9 = vsyncpa [#allocation4], 0  ;;  %s213_s9 = smov [#allocation2]  }
   0x3   :  { %s15_s10 = sshll.u32 %s213_s9, 4  ;;  %s16_s10 = int_to_ptr.vmem [resolvable:$true] %s15_s10 }
   0x4   :  { %s155_s11 = scalar_lea.vmem %s16_s10, 256  ;;  %p160_p1 = scmp.lt.s32.totalorder %s16_s10, %s16_s10 }
   0x5   :  { %p156_p0 = scmp.ne.s32.totalorder %s16_s10, %s155_s11  ;;  %p161_p2 = scmp.lt.s32.totalorder %s155_s11, %s155_s11 }
   0x7   :  { %p162_p3 = por %p161_p2, %p160_p1 }
   0x9   :  { %p163_p4 = pnand %p162_p3, %p156_p0 }
   0xb   :  { %166 = shalt.err (!%p163_p4)
}
   0xc   :  { %s214_s12 = smov 128   ;;  %s215_s13 = smov 8  }
   0xd   :  { %21 = dma.hbm_to_vmem [thread:$0]  %s252_s0, 256, %s16_s10, [#allocation3], %s214_s12, %s214_s12, %s215_s13  }
   0xe   :  { %s216_s16 = smov [#allocation5]  }
   0xf   :  { %s27_s17 = sshll.u32 %s216_s16, 4  ;;  %s28_s17 = int_to_ptr.vmem [resolvable:$true] %s27_s17 }
  0x10   :  { %s175_s18 = scalar_lea.vmem %s28_s17, 256  ;;  %p180_p6 = scmp.lt.s32.totalorder %s28_s17, %s28_s17 }
  0x11   :  { %p176_p5 = scmp.ne.s32.totalorder %s28_s17, %s175_s18  ;;  %p181_p7 = scmp.lt.s32.totalorder %s175_s18, %s175_s18 }
  0x13   :  { %p182_p8 = por %p181_p7, %p180_p6 }
  0x15   :  { %p183_p9 = pnand %p182_p8, %p176_p5 }
  0x17   :  { %186 = shalt.err (!%p183_p9)
}
  0x18   :  { %33 = dma.hbm_to_vmem [thread:$0]  %s253_s1, 256, %s28_s17, [#allocation6], %s214_s12, %s214_s12, %s215_s13  }
  0x19   :  { %207 = dma.done.wait [#allocation3], 256  }
  0x1a   :  { %208 = vsyncadd [#allocation3], 4294967040 }
  0x1b   :  { %209 = dma.done.wait [#allocation6], 256  }
  0x1c   :  { %210 = vsyncadd [#allocation6], 4294967040  ;;  %v40_v0 = vld [vmem:[#allocation2] sm:$0xff]  ;;  %v41_v1 = vld [vmem:[#allocation2 + $0x8] sm:$0xff]  ;;  %s217_s0 = smov [#allocation7]  }
  0x1d   :  { %v44_v2 = vand.u32 2147483647, %v40_v0  ;;  %v45_v3 = vand.u32 2147483647, %v41_v1  ;;  %v42_v12 = vld [vmem:[#allocation5] sm:$0xff]  ;;  %v62_v13 = vsub.f32 0.0, %v40_v0 }
  0x1e   :  { %v43_v14 = vld [vmem:[#allocation5 + $0x8] sm:$0xff]  ;;  %v84_v15 = vsub.f32 1.0, %v42_v12  ;;  %v63_v16 = vsub.f32 0.0, %v41_v1  ;;  %v58_v17 = vmin.f32 %v40_v0, 0.0  ;;  %vm72_vm0 = vcmp.ge.f32.partialorder %v40_v0, 0.0  ;;  %s117_s1 = sshll.u32 %s217_s0, 4  ;;  %s118_s1 = int_to_ptr.vmem [resolvable:$true] %s117_s1 }
  0x1f   :  { %v46_v4 = vsub.f32 0.0, %v44_v2  ;;  %v47_v5 = vsub.f32 0.0, %v45_v3  ;;  %v64_v18 = vmin.f32 %v62_v13, 0.0  ;;  %v85_v20 = vsub.f32 1.0, %v43_v14  ;;  %s187_s21 = scalar_lea.vmem %s118_s1, 256  ;;  %p192_p11 = scmp.lt.s32.totalorder %s118_s1, %s118_s1 }
  0x20   :  { %v92_v23 = vmul.f32 0.25, %v42_v12  ;;  %v59_v24 = vmin.f32 %v41_v1, 0.0  ;;  %v94_v27 = vmul.f32 0.75, %v84_v15  ;;  %vm98_vm1 = vcmp.eq.f32.partialorder %v42_v12, 1.0  ;;  %p188_p10 = scmp.ne.s32.totalorder %s118_s1, %s187_s21  ;;  %p193_p12 = scmp.lt.s32.totalorder %s187_s21, %s187_s21 }
  0x21   :  { %v48_v6 = vmul.f32 1.442695, %v46_v4  ;;  %v50_v7 = vmul.f32 1.442695, %v47_v5  ;;  %v65_v28 = vmin.f32 %v63_v16, 0.0  ;;  %vm73_vm2 = vcmp.ge.f32.partialorder %v41_v1, 0.0 }
  0x22   :  { %v93_v35 = vmul.f32 0.25, %v43_v14  ;;  %v95_v36 = vmul.f32 0.75, %v85_v20  ;;  %v96_v41 = vadd.f32 %v94_v27, %v92_v23  ;;  %vm99_vm3 = vcmp.eq.f32.partialorder %v43_v14, 1.0  ;;  %p194_p13 = por %p193_p12, %p192_p11 }
  0x23   :  { %135 = vpow2.f32 %v48_v6 }
  0x24   :  { %137 = vpow2.f32 %v50_v7  ;;  %v97_v53 = vadd.f32 %v95_v36, %v93_v35  ;;  %p195_p0 = pnand %p194_p13, %p188_p10 }
  0x30   :  { %v136_v8 = vpop.eup %135 }
  0x31   :  { %v138_v9 = vpop.eup %137  ;;  %v52_v10 = vadd.f32 1.0, %v136_v8 }
  0x32   :  { %v53_v11 = vadd.f32 1.0, %v138_v9 }
  0x33   :  { %139 = vlog2.f32 %v52_v10 }
  0x34   :  { %141 = vrcp.f32 %v52_v10 }
  0x35   :  { %143 = vlog2.f32 %v53_v11 }
  0x36   :  { %145 = vrcp.f32 %v53_v11 }
  0x40   :  { %v140_v19 = vpop.eup %139 }
  0x41   :  { %v142_v21 = vpop.eup %141  ;;  %v55_v22 = vmul.f32 0.6931472, %v140_v19 }
  0x42   :  { %v144_v25 = vpop.eup %143  ;;  %v74_v26 = vmul.f32 %v142_v21, %v136_v8 }
  0x43   :  { %v146_v29 = vpop.eup %145  ;;  %v60_v30 = vsub.f32 %v58_v17, %v55_v22  ;;  %v66_v31 = vsub.f32 %v64_v18, %v55_v22  ;;  %v57_v32 = vmul.f32 0.6931472, %v144_v25 }
  0x44   :  { %v76_v33 = vsel %vm72_vm0, %v142_v21, %v74_v26  ;;  %v75_v34 = vmul.f32 %v146_v29, %v138_v9 }
  0x45   :  { %v78_v37 = vmax.f32 %v60_v30, -100.0  ;;  %v80_v38 = vmax.f32 %v66_v31, -100.0  ;;  %v100_v39 = vsub.f32 1.0, %v76_v33  ;;  %v61_v40 = vsub.f32 %v59_v24, %v57_v32 }
  0x46   :  { %v67_v42 = vsub.f32 %v65_v28, %v57_v32  ;;  %v77_v43 = vsel %vm73_vm2, %v146_v29, %v75_v34 }
  0x47   :  { %v82_v44 = vmul.f32 %v78_v37, %v42_v12  ;;  %v86_v45 = vmul.f32 %v84_v15, %v80_v38  ;;  %v102_v46 = vsel %vm98_vm1, %v100_v39, %v76_v33  ;;  %v79_v47 = vmax.f32 %v61_v40, -100.0 }
  0x48   :  { %v104_v48 = vmul.f32 %v102_v46, %v102_v46  ;;  %v81_v49 = vmax.f32 %v67_v42, -100.0  ;;  %v101_v50 = vsub.f32 1.0, %v77_v43 }
  0x49   :  { %v88_v51 = vadd.f32 %v86_v45, %v82_v44  ;;  %v83_v52 = vmul.f32 %v79_v47, %v43_v14 }
  0x4a   :  { %v106_v54 = vmul.f32 %v104_v48, %v96_v41  ;;  %v87_v55 = vmul.f32 %v85_v20, %v81_v49  ;;  %v103_v56 = vsel %vm99_vm3, %v101_v50, %v77_v43 }
  0x4b   :  { %v90_v57 = vsub.f32 0.0, %v88_v51  ;;  %v105_v58 = vmul.f32 %v103_v56, %v103_v56 }
  0x4c   :  { %v89_v59 = vadd.f32 %v87_v55, %v83_v52 }
  0x4d   :  { %v108_v60 = vmul.f32 %v106_v54, %v90_v57  ;;  %v107_v61 = vmul.f32 %v105_v58, %v97_v53 }
  0x4e   :  { %v91_v62 = vsub.f32 0.0, %v89_v59 }
  0x4f   :  { %110 = vst [vmem:[#allocation7] sm:$0xff] %v108_v60 }
  0x50   :  { %v109_v63 = vmul.f32 %v107_v61, %v91_v62 }
  0x52   :  { %111 = vst [vmem:[#allocation7 + $0x8] sm:$0xff] %v109_v63 }
  0x53   :  { %198 = shalt.err (!%p195_p0)
}
  0x54   :  { %123 = dma.vmem_to_hbm [thread:$0]  %s118_s1, 256, %s254_s2, [#allocation4], %s214_s12, %s214_s12, %s215_s13  }
  0x55   :  { %211 = dma.done.wait [#allocation4], 256  }
  0x56   :  { %212 = vsyncadd [#allocation4], 4294967040 }
  0x57   :  { %127 = vsyncpa [#allocation3], 1 }
  0x58   :  { %128 = vsyncpa [#allocation6], 1 }
  0x59   :  { %129 = vsyncpa [#allocation4], 1 }

</bundles_post_ra>
